<compile_context>
chip_gen: v5e
topology: v5e:2x2
jax: 0.10.0
libtpu: 0.0.40
codegen_flags: <defaults>
</compile_context>

<pallas_src>
import math
import functools

import jax
import jax.numpy as jnp
from jax import lax
from jax.experimental import pallas as pl
from jax.experimental.pallas import tpu as pltpu


def _mha_kernel(n_head, head_dim, scale,
                q_ref, k_ref, v_ref, bias_ref,
                wq_ref, bq_ref, wk_ref, bk_ref, wv_ref, bv_ref,
                wo_ref, bo_ref,
                o_ref):
    """Fused MHA forward for one batch element (one grid step).

    q_ref: (S, E) bf16        k_ref / v_ref: (T, E) bf16
    bias_ref: (S, T) f32 additive mask (0 keep / -1e30 drop)
    wq/wk/wv/wo_ref: (E, E) bf16 fused lane-dense weights; b*_ref: (1, E) f32
    o_ref: (S, E) f32
    """
    f32, bf16 = jnp.float32, jnp.bfloat16
    dn_mm = (((1,), (0,)), ((), ()))   # (M,K)@(K,N) -> (M,N)
    dn_qk = (((1,), (1,)), ((), ()))   # contract last dims: Q @ K^T without a transpose

    # Fused lane-dense projections: one (S,E)@(E,E) MXU matmul each, f32 accumulation,
    # then a single cast back to bf16 (softmax math stays f32 below).
    q_p = ((lax.dot_general(q_ref[...], wq_ref[...], dn_mm,
                            preferred_element_type=f32) + bq_ref[...]) * scale
           ).astype(bf16)                                               # (S, E)
    k_p = (lax.dot_general(k_ref[...], wk_ref[...], dn_mm,
                           preferred_element_type=f32) + bk_ref[...]).astype(bf16)
    v_p = (lax.dot_general(v_ref[...], wv_ref[...], dn_mm,
                           preferred_element_type=f32) + bv_ref[...]).astype(bf16)

    bias = bias_ref[...]                                                # (S, T) f32

    # Heads split only here, via static lane slices of the projected activations.
    # TODO(synk): at large H / production tiles use a head grid axis or lax.fori_loop
    # to bound vreg live ranges; unrolled static loop is fine for H=2.
    ctx_parts = []
    for h in range(n_head):
        sl = slice(h * head_dim, (h + 1) * head_dim)
        s = lax.dot_general(q_p[:, sl], k_p[:, sl], dn_qk,
                            preferred_element_type=f32) + bias          # (S, T) f32

        # numerically stable softmax in f32; the divide goes to the EUP slot
        m = jnp.max(s, axis=-1, keepdims=True)
        p = jnp.exp(s - m)
        attn = p * pl.reciprocal(jnp.sum(p, axis=-1, keepdims=True), approx=True)
        # TODO(synk): attention dropout (p=0.1) is identity here (eval-mode semantics).

        ctx_parts.append(
            lax.dot_general(attn.astype(bf16), v_p[:, sl], dn_mm,
                            preferred_element_type=f32).astype(bf16))   # (S, Dh)

    # Re-assemble a lane-dense (S, E) context and do ONE fused output projection.
    ctx = jnp.concatenate(ctx_parts, axis=-1)                           # (S, E) bf16
    out = lax.dot_general(ctx, wo_ref[...], dn_mm,
                          preferred_element_type=f32) + bo_ref[...]     # (S, E) f32
    o_ref[...] = out.astype(o_ref.dtype)


def multi_head_attention(query, key, value, params, n_head, attn_mask=None):
    """query: (N,S,E), key/value: (N,T,E). params hold (E,E) weights already in
    (in, out) layout (transpose of PyTorch nn.Linear) and (E,) biases. Returns (N,S,E)."""
    N, S, E = query.shape
    _, T, _ = value.shape
    assert E % n_head == 0
    head_dim = E // n_head
    scale = 1.0 / math.sqrt(head_dim)
    f32, bf16 = jnp.float32, jnp.bfloat16

    # bf16 activations into the kernel (halves HBM->VMEM DMA); weights bf16, biases f32.
    q_b = query.astype(bf16)
    k_b = key.astype(bf16)
    v_b = value.astype(bf16)

    # Tiny (S, T) additive mask shared by every batch grid step (no N^2*S*T mask).
    if attn_mask is None:
        bias = jnp.zeros((S, T), f32)
    else:
        bias = jnp.where(attn_mask != 0, 0.0, -1e30).astype(f32)

    wq = params["wq"].astype(bf16)
    wk = params["wk"].astype(bf16)
    wv = params["wv"].astype(bf16)
    wo = params["wo"].astype(bf16)
    bq = params["bq"].reshape(1, E).astype(f32)
    bk = params["bk"].reshape(1, E).astype(f32)
    bv = params["bv"].reshape(1, E).astype(f32)
    bo = params["bo"].reshape(1, E).astype(f32)

    kernel = functools.partial(_mha_kernel, n_head, head_dim, scale)

    q_spec = pl.BlockSpec((None, S, E), lambda b: (b, 0, 0))
    kv_spec = pl.BlockSpec((None, T, E), lambda b: (b, 0, 0))

    def bcast(shape):
        # batch-invariant operand (weights / biases / mask): same block every step
        return pl.BlockSpec(shape, lambda b: (0, 0))

    out = pl.pallas_call(
        kernel,
        out_shape=jax.ShapeDtypeStruct((N, S, E), query.dtype),
        grid=(N,),
        in_specs=[q_spec, kv_spec, kv_spec,
                  bcast((S, T)),
                  bcast((E, E)), bcast((1, E)),
                  bcast((E, E)), bcast((1, E)),
                  bcast((E, E)), bcast((1, E)),
                  bcast((E, E)), bcast((1, E))],
        out_specs=pl.BlockSpec((None, S, E), lambda b: (b, 0, 0)),
        compiler_params=pltpu.CompilerParams(
            dimension_semantics=("parallel",)),
    )(q_b, k_b, v_b, bias, wq, bq, wk, bk, wv, bv, wo, bo)
    return out


def _reference_mha(query, key, value, params, n_head, attn_mask=None):
    """Pure-JAX f32 reference mirroring the PyTorch forward (dropout in eval mode)."""
    N, S, E = query.shape
    _, T, _ = value.shape
    head_dim = E // n_head
    q = query @ params["wq"] + params["bq"]
    k = key @ params["wk"] + params["bk"]
    v = value @ params["wv"] + params["bv"]
    q = q.reshape(N, S, n_head, head_dim).transpose(0, 2, 1, 3)
    k = k.reshape(N, T, n_head, head_dim).transpose(0, 2, 1, 3)
    v = v.reshape(N, T, n_head, head_dim).transpose(0, 2, 1, 3)
    scores = jnp.einsum("nhsd,nhtd->nhst", q, k) / math.sqrt(head_dim)
    if attn_mask is not None:
        scores = jnp.where(attn_mask == 0, -jnp.inf, scores)
    attn = jax.nn.softmax(scores, axis=-1)
    out = jnp.einsum("nhst,nhtd->nhsd", attn, v)
    out = out.transpose(0, 2, 1, 3).reshape(N, S, E)
    return out @ params["wo"] + params["bo"]


if __name__ == "__main__":
    # Small, module-consistent shapes: batch=2, seq=8, embed=32, heads=2.
    N, S, T, E, H = 2, 8, 8, 32, 2

    key0 = jax.random.PRNGKey(0)
    ks = jax.random.split(key0, 12)

    # nn.Linear-like uniform(-1/sqrt(E), 1/sqrt(E)) init; weights stored as
    # (E_in, E_out) = transpose of PyTorch's (out, in).
    bound = 1.0 / math.sqrt(E)
    params = {
        "wq": jax.random.uniform(ks[0], (E, E), jnp.float32, -bound, bound),
        "bq": jax.random.uniform(ks[1], (E,),  jnp.float32, -bound, bound),
        "wk": jax.random.uniform(ks[2], (E, E), jnp.float32, -bound, bound),
        "bk": jax.random.uniform(ks[3], (E,),  jnp.float32, -bound, bound),
        "wv": jax.random.uniform(ks[4], (E, E), jnp.float32, -bound, bound),
        "bv": jax.random.uniform(ks[5], (E,),  jnp.float32, -bound, bound),
        "wo": jax.random.uniform(ks[6], (E, E), jnp.float32, -bound, bound),
        "bo": jax.random.uniform(ks[7], (E,),  jnp.float32, -bound, bound),
    }

    query = jax.random.normal(ks[8], (N, S, E), jnp.float32)
    kv_in = jax.random.normal(ks[9], (N, T, E), jnp.float32)

    # causal-ish mask (S, T): mask[i, j] == 0 means "do not attend"
    attn_mask = (jnp.arange(T)[None, :] <= jnp.arange(S)[:, None]).astype(jnp.float32)

    out = multi_head_attention(query, kv_in, kv_in, params, H, attn_mask=attn_mask)
    out = jax.block_until_ready(out)

    ref = _reference_mha(query, kv_in, kv_in, params, H, attn_mask=attn_mask)
    assert out.shape == (N, S, E)
    # bf16 inputs / MXU operands (f32 accumulation) + approx reciprocal -> relaxed tol
    assert jnp.allclose(out, ref, atol=5e-2, rtol=5e-2), "mismatch vs JAX reference"

    print("KERNEL_OK")
</pallas_src>

<mosaic_0001>
module attributes {stable_mosaic.version = 11 : i64} {
  func.func @_mha_kernel(%arg0: i32, %arg1: memref<1x8x32xbf16, #tpu.memory_space<vmem>>, %arg2: memref<1x8x32xbf16, #tpu.memory_space<vmem>>, %arg3: memref<1x8x32xbf16, #tpu.memory_space<vmem>>, %arg4: memref<8x8xf32, #tpu.memory_space<vmem>>, %arg5: memref<32x32xbf16, #tpu.memory_space<vmem>>, %arg6: memref<1x32xf32, #tpu.memory_space<vmem>>, %arg7: memref<32x32xbf16, #tpu.memory_space<vmem>>, %arg8: memref<1x32xf32, #tpu.memory_space<vmem>>, %arg9: memref<32x32xbf16, #tpu.memory_space<vmem>>, %arg10: memref<1x32xf32, #tpu.memory_space<vmem>>, %arg11: memref<32x32xbf16, #tpu.memory_space<vmem>>, %arg12: memref<1x32xf32, #tpu.memory_space<vmem>>, %arg13: memref<1x8x32xf32, #tpu.memory_space<vmem>>) attributes {dimension_semantics = [#tpu.dimension_semantics<parallel>], iteration_bounds = array<i64: 2>, scalar_prefetch = 0 : i64, scratch_operands = 0 : i64, tpu.core_type = #tpu.core_type<tc>, window_params = [{transform_indices = @transform_0, window_bounds = array<i64: 1, 8, 32>}, {transform_indices = @transform_1, window_bounds = array<i64: 1, 8, 32>}, {transform_indices = @transform_2, window_bounds = array<i64: 1, 8, 32>}, {pipeline_mode = #tpu.pipeline_mode<synchronous>, transform_indices = @transform_3, window_bounds = array<i64: 8, 8>}, {pipeline_mode = #tpu.pipeline_mode<synchronous>, transform_indices = @transform_4, window_bounds = array<i64: 32, 32>}, {pipeline_mode = #tpu.pipeline_mode<synchronous>, transform_indices = @transform_5, window_bounds = array<i64: 1, 32>}, {pipeline_mode = #tpu.pipeline_mode<synchronous>, transform_indices = @transform_6, window_bounds = array<i64: 32, 32>}, {pipeline_mode = #tpu.pipeline_mode<synchronous>, transform_indices = @transform_7, window_bounds = array<i64: 1, 32>}, {pipeline_mode = #tpu.pipeline_mode<synchronous>, transform_indices = @transform_8, window_bounds = array<i64: 32, 32>}, {pipeline_mode = #tpu.pipeline_mode<synchronous>, transform_indices = @transform_9, window_bounds = array<i64: 1, 32>}, {pipeline_mode = #tpu.pipeline_mode<synchronous>, transform_indices = @transform_10, window_bounds = array<i64: 32, 32>}, {pipeline_mode = #tpu.pipeline_mode<synchronous>, transform_indices = @transform_11, window_bounds = array<i64: 1, 32>}, {transform_indices = @transform_12, window_bounds = array<i64: 1, 8, 32>}]} {
    %c0 = arith.constant 0 : index
    %c0_0 = arith.constant 0 : index
    %c0_1 = arith.constant 0 : index
    %0 = vector.load %arg1[%c0, %c0_0, %c0_1] : memref<1x8x32xbf16, #tpu.memory_space<vmem>>, vector<1x8x32xbf16>
    %1 = vector.shape_cast %0 : vector<1x8x32xbf16> to vector<8x32xbf16>
    %c0_2 = arith.constant 0 : index
    %c0_3 = arith.constant 0 : index
    %2 = vector.load %arg5[%c0_2, %c0_3] : memref<32x32xbf16, #tpu.memory_space<vmem>>, vector<32x32xbf16>
    %cst = arith.constant dense<0.000000e+00> : vector<8x32xf32>
    %3 = tpu.matmul %1, %2, %cst {dimension_numbers = #tpu.dot_dimension_numbers<[1], [0], [0], [1], [0, 0, 1, 1], [], []>} : vector<8x32xbf16>, vector<32x32xbf16>, vector<8x32xf32> -> vector<8x32xf32>
    %c0_4 = arith.constant 0 : index
    %c0_5 = arith.constant 0 : index
    %4 = vector.load %arg6[%c0_4, %c0_5] : memref<1x32xf32, #tpu.memory_space<vmem>>, vector<1x32xf32>
    %5 = vector.broadcast %4 : vector<1x32xf32> to vector<8x32xf32>
    %6 = arith.addf %3, %5 : vector<8x32xf32>
    %cst_6 = arith.constant 2.500000e-01 : f32
    %7 = vector.broadcast %cst_6 : f32 to vector<8x32xf32>
    %8 = arith.mulf %6, %7 : vector<8x32xf32>
    %9 = arith.truncf %8 : vector<8x32xf32> to vector<8x32xbf16>
    %c0_7 = arith.constant 0 : index
    %c0_8 = arith.constant 0 : index
    %c0_9 = arith.constant 0 : index
    %10 = vector.load %arg2[%c0_7, %c0_8, %c0_9] : memref<1x8x32xbf16, #tpu.memory_space<vmem>>, vector<1x8x32xbf16>
    %11 = vector.shape_cast %10 : vector<1x8x32xbf16> to vector<8x32xbf16>
    %c0_10 = arith.constant 0 : index
    %c0_11 = arith.constant 0 : index
    %12 = vector.load %arg7[%c0_10, %c0_11] : memref<32x32xbf16, #tpu.memory_space<vmem>>, vector<32x32xbf16>
    %cst_12 = arith.constant dense<0.000000e+00> : vector<8x32xf32>
    %13 = tpu.matmul %11, %12, %cst_12 {dimension_numbers = #tpu.dot_dimension_numbers<[1], [0], [0], [1], [0, 0, 1, 1], [], []>} : vector<8x32xbf16>, vector<32x32xbf16>, vector<8x32xf32> -> vector<8x32xf32>
    %c0_13 = arith.constant 0 : index
    %c0_14 = arith.constant 0 : index
    %14 = vector.load %arg8[%c0_13, %c0_14] : memref<1x32xf32, #tpu.memory_space<vmem>>, vector<1x32xf32>
    %15 = vector.broadcast %14 : vector<1x32xf32> to vector<8x32xf32>
    %16 = arith.addf %13, %15 : vector<8x32xf32>
    %17 = arith.truncf %16 : vector<8x32xf32> to vector<8x32xbf16>
    %c0_15 = arith.constant 0 : index
    %c0_16 = arith.constant 0 : index
    %c0_17 = arith.constant 0 : index
    %18 = vector.load %arg3[%c0_15, %c0_16, %c0_17] : memref<1x8x32xbf16, #tpu.memory_space<vmem>>, vector<1x8x32xbf16>
    %19 = vector.shape_cast %18 : vector<1x8x32xbf16> to vector<8x32xbf16>
    %c0_18 = arith.constant 0 : index
    %c0_19 = arith.constant 0 : index
    %20 = vector.load %arg9[%c0_18, %c0_19] : memref<32x32xbf16, #tpu.memory_space<vmem>>, vector<32x32xbf16>
    %cst_20 = arith.constant dense<0.000000e+00> : vector<8x32xf32>
    %21 = tpu.matmul %19, %20, %cst_20 {dimension_numbers = #tpu.dot_dimension_numbers<[1], [0], [0], [1], [0, 0, 1, 1], [], []>} : vector<8x32xbf16>, vector<32x32xbf16>, vector<8x32xf32> -> vector<8x32xf32>
    %c0_21 = arith.constant 0 : index
    %c0_22 = arith.constant 0 : index
    %22 = vector.load %arg10[%c0_21, %c0_22] : memref<1x32xf32, #tpu.memory_space<vmem>>, vector<1x32xf32>
    %23 = vector.broadcast %22 : vector<1x32xf32> to vector<8x32xf32>
    %24 = arith.addf %21, %23 : vector<8x32xf32>
    %25 = arith.truncf %24 : vector<8x32xf32> to vector<8x32xbf16>
    %c0_23 = arith.constant 0 : index
    %c0_24 = arith.constant 0 : index
    %26 = vector.load %arg4[%c0_23, %c0_24] : memref<8x8xf32, #tpu.memory_space<vmem>>, vector<8x8xf32>
    %27 = vector.extract_strided_slice %9 {offsets = [0, 0], sizes = [8, 16], strides = [1, 1]} : vector<8x32xbf16> to vector<8x16xbf16>
    %28 = vector.extract_strided_slice %17 {offsets = [0, 0], sizes = [8, 16], strides = [1, 1]} : vector<8x32xbf16> to vector<8x16xbf16>
    %cst_25 = arith.constant dense<0.000000e+00> : vector<8x8xf32>
    %29 = tpu.matmul %27, %28, %cst_25 {dimension_numbers = #tpu.dot_dimension_numbers<[1], [1], [0], [0], [0, 0, 1, 0], [], []>} : vector<8x16xbf16>, vector<8x16xbf16>, vector<8x8xf32> -> vector<8x8xf32>
    %30 = arith.addf %29, %26 : vector<8x8xf32>
    %cst_26 = arith.constant dense<0xFF800000> : vector<8xf32>
    %31 = vector.multi_reduction <maximumf>, %30, %cst_26 [1] : vector<8x8xf32> to vector<8xf32>
    %32 = vector.shape_cast %31 : vector<8xf32> to vector<8x1xf32>
    %33 = vector.broadcast %32 : vector<8x1xf32> to vector<8x8xf32>
    %34 = arith.subf %30, %33 : vector<8x8xf32>
    %35 = math.exp %34 : vector<8x8xf32>
    %cst_27 = arith.constant dense<0.000000e+00> : vector<8xf32>
    %36 = vector.multi_reduction <add>, %35, %cst_27 [1] : vector<8x8xf32> to vector<8xf32>
    %37 = vector.shape_cast %36 : vector<8xf32> to vector<8x1xf32>
    %38 = tpu.reciprocal %37 {approx = true} : vector<8x1xf32> -> vector<8x1xf32>
    %39 = vector.broadcast %38 : vector<8x1xf32> to vector<8x8xf32>
    %40 = arith.mulf %35, %39 : vector<8x8xf32>
    %41 = arith.truncf %40 : vector<8x8xf32> to vector<8x8xbf16>
    %42 = vector.extract_strided_slice %25 {offsets = [0, 0], sizes = [8, 16], strides = [1, 1]} : vector<8x32xbf16> to vector<8x16xbf16>
    %cst_28 = arith.constant dense<0.000000e+00> : vector<8x16xf32>
    %43 = tpu.matmul %41, %42, %cst_28 {dimension_numbers = #tpu.dot_dimension_numbers<[1], [0], [0], [1], [0, 0, 1, 1], [], []>} : vector<8x8xbf16>, vector<8x16xbf16>, vector<8x16xf32> -> vector<8x16xf32>
    %44 = arith.truncf %43 : vector<8x16xf32> to vector<8x16xbf16>
    %45 = vector.extract_strided_slice %9 {offsets = [0, 16], sizes = [8, 16], strides = [1, 1]} : vector<8x32xbf16> to vector<8x16xbf16>
    %46 = vector.extract_strided_slice %17 {offsets = [0, 16], sizes = [8, 16], strides = [1, 1]} : vector<8x32xbf16> to vector<8x16xbf16>
    %cst_29 = arith.constant dense<0.000000e+00> : vector<8x8xf32>
    %47 = tpu.matmul %45, %46, %cst_29 {dimension_numbers = #tpu.dot_dimension_numbers<[1], [1], [0], [0], [0, 0, 1, 0], [], []>} : vector<8x16xbf16>, vector<8x16xbf16>, vector<8x8xf32> -> vector<8x8xf32>
    %48 = arith.addf %47, %26 : vector<8x8xf32>
    %cst_30 = arith.constant dense<0xFF800000> : vector<8xf32>
    %49 = vector.multi_reduction <maximumf>, %48, %cst_30 [1] : vector<8x8xf32> to vector<8xf32>
    %50 = vector.shape_cast %49 : vector<8xf32> to vector<8x1xf32>
    %51 = vector.broadcast %50 : vector<8x1xf32> to vector<8x8xf32>
    %52 = arith.subf %48, %51 : vector<8x8xf32>
    %53 = math.exp %52 : vector<8x8xf32>
    %cst_31 = arith.constant dense<0.000000e+00> : vector<8xf32>
    %54 = vector.multi_reduction <add>, %53, %cst_31 [1] : vector<8x8xf32> to vector<8xf32>
    %55 = vector.shape_cast %54 : vector<8xf32> to vector<8x1xf32>
    %56 = tpu.reciprocal %55 {approx = true} : vector<8x1xf32> -> vector<8x1xf32>
    %57 = vector.broadcast %56 : vector<8x1xf32> to vector<8x8xf32>
    %58 = arith.mulf %53, %57 : vector<8x8xf32>
    %59 = arith.truncf %58 : vector<8x8xf32> to vector<8x8xbf16>
    %60 = vector.extract_strided_slice %25 {offsets = [0, 16], sizes = [8, 16], strides = [1, 1]} : vector<8x32xbf16> to vector<8x16xbf16>
    %cst_32 = arith.constant dense<0.000000e+00> : vector<8x16xf32>
    %61 = tpu.matmul %59, %60, %cst_32 {dimension_numbers = #tpu.dot_dimension_numbers<[1], [0], [0], [1], [0, 0, 1, 1], [], []>} : vector<8x8xbf16>, vector<8x16xbf16>, vector<8x16xf32> -> vector<8x16xf32>
    %62 = arith.truncf %61 : vector<8x16xf32> to vector<8x16xbf16>
    %63 = tpu.concatenate %44, %62 in 1 : vector<8x16xbf16>, vector<8x16xbf16> -> vector<8x32xbf16>
    %c0_33 = arith.constant 0 : index
    %c0_34 = arith.constant 0 : index
    %64 = vector.load %arg11[%c0_33, %c0_34] : memref<32x32xbf16, #tpu.memory_space<vmem>>, vector<32x32xbf16>
    %cst_35 = arith.constant dense<0.000000e+00> : vector<8x32xf32>
    %65 = tpu.matmul %63, %64, %cst_35 {dimension_numbers = #tpu.dot_dimension_numbers<[1], [0], [0], [1], [0, 0, 1, 1], [], []>} : vector<8x32xbf16>, vector<32x32xbf16>, vector<8x32xf32> -> vector<8x32xf32>
    %c0_36 = arith.constant 0 : index
    %c0_37 = arith.constant 0 : index
    %66 = vector.load %arg12[%c0_36, %c0_37] : memref<1x32xf32, #tpu.memory_space<vmem>>, vector<1x32xf32>
    %67 = vector.broadcast %66 : vector<1x32xf32> to vector<8x32xf32>
    %68 = arith.addf %65, %67 : vector<8x32xf32>
    %c0_38 = arith.constant 0 : index
    %c0_39 = arith.constant 0 : index
    %c0_40 = arith.constant 0 : index
    %69 = vector.load %arg13[%c0_38, %c0_39, %c0_40] : memref<1x8x32xf32, #tpu.memory_space<vmem>>, vector<1x8x32xf32>
    %70 = vector.shape_cast %69 : vector<1x8x32xf32> to vector<8x32xf32>
    %71 = vector.shape_cast %68 : vector<8x32xf32> to vector<1x8x32xf32>
    tpu.vector_store %arg13[%c0_38, %c0_39, %c0_40], %71 {strides = array<i32>} : memref<1x8x32xf32, #tpu.memory_space<vmem>>, vector<1x8x32xf32>,
    return
  }
  func.func @transform_0(%arg0: i32) -> (i32, i32, i32) {
    %c0_i32 = arith.constant 0 : i32
    %c0_i32_0 = arith.constant 0 : i32
    %c0_i32_1 = arith.constant 0 : i32
    return %arg0, %c0_i32, %c0_i32_0 : i32, i32, i32
  }
  func.func @transform_1(%arg0: i32) -> (i32, i32, i32) {
    %c0_i32 = arith.constant 0 : i32
    %c0_i32_0 = arith.constant 0 : i32
    %c0_i32_1 = arith.constant 0 : i32
    return %arg0, %c0_i32, %c0_i32_0 : i32, i32, i32
  }
  func.func @transform_2(%arg0: i32) -> (i32, i32, i32) {
    %c0_i32 = arith.constant 0 : i32
    %c0_i32_0 = arith.constant 0 : i32
    %c0_i32_1 = arith.constant 0 : i32
    return %arg0, %c0_i32, %c0_i32_0 : i32, i32, i32
  }
  func.func @transform_3(%arg0: i32) -> (i32, i32) {
    %c0_i32 = arith.constant 0 : i32
    %c0_i32_0 = arith.constant 0 : i32
    %c0_i32_1 = arith.constant 0 : i32
    return %c0_i32, %c0_i32_0 : i32, i32
  }
  func.func @transform_4(%arg0: i32) -> (i32, i32) {
    %c0_i32 = arith.constant 0 : i32
    %c0_i32_0 = arith.constant 0 : i32
    %c0_i32_1 = arith.constant 0 : i32
    return %c0_i32, %c0_i32_0 : i32, i32
  }
  func.func @transform_5(%arg0: i32) -> (i32, i32) {
    %c0_i32 = arith.constant 0 : i32
    %c0_i32_0 = arith.constant 0 : i32
    %c0_i32_1 = arith.constant 0 : i32
    return %c0_i32, %c0_i32_0 : i32, i32
  }
  func.func @transform_6(%arg0: i32) -> (i32, i32) {
    %c0_i32 = arith.constant 0 : i32
    %c0_i32_0 = arith.constant 0 : i32
    %c0_i32_1 = arith.constant 0 : i32
    return %c0_i32, %c0_i32_0 : i32, i32
  }
  func.func @transform_7(%arg0: i32) -> (i32, i32) {
    %c0_i32 = arith.constant 0 : i32
    %c0_i32_0 = arith.constant 0 : i32
    %c0_i32_1 = arith.constant 0 : i32
    return %c0_i32, %c0_i32_0 : i32, i32
  }
  func.func @transform_8(%arg0: i32) -> (i32, i32) {
    %c0_i32 = arith.constant 0 : i32
    %c0_i32_0 = arith.constant 0 : i32
    %c0_i32_1 = arith.constant 0 : i32
    return %c0_i32, %c0_i32_0 : i32, i32
  }
  func.func @transform_9(%arg0: i32) -> (i32, i32) {
    %c0_i32 = arith.constant 0 : i32
    %c0_i32_0 = arith.constant 0 : i32
    %c0_i32_1 = arith.constant 0 : i32
    return %c0_i32, %c0_i32_0 : i32, i32
  }
  func.func @transform_10(%arg0: i32) -> (i32, i32) {
    %c0_i32 = arith.constant 0 : i32
    %c0_i32_0 = arith.constant 0 : i32
    %c0_i32_1 = arith.constant 0 : i32
    return %c0_i32, %c0_i32_0 : i32, i32
  }
  func.func @transform_11(%arg0: i32) -> (i32, i32) {
    %c0_i32 = arith.constant 0 : i32
    %c0_i32_0 = arith.constant 0 : i32
    %c0_i32_1 = arith.constant 0 : i32
    return %c0_i32, %c0_i32_0 : i32, i32
  }
  func.func @transform_12(%arg0: i32) -> (i32, i32, i32) {
    %c0_i32 = arith.constant 0 : i32
    %c0_i32_0 = arith.constant 0 : i32
    %c0_i32_1 = arith.constant 0 : i32
    return %arg0, %c0_i32, %c0_i32_0 : i32, i32, i32
  }
}

</mosaic_0001>

<bundles_post_ra>
// kernel: tpu_custom_call.1
= control target key start
LH: loop header
LB: loop body
LE: loop exit
PB: predicated region body
PF: predicated region fallthrough
CT: control target
= control target key end

     0   :  { %s1921_s0 = inlined_call_operand.hbm [shape: bf16[2,8,32], index: 0, kind: input, shape index: {}]   ;;  %s1922_s1 = inlined_call_operand.hbm [shape: bf16[2,8,32], index: 1, kind: input, shape index: {}]   ;;  %s1923_s2 = inlined_call_operand.hbm [shape: bf16[2,8,32], index: 2, kind: input, shape index: {}]   ;;  %s1924_s3 = inlined_call_operand.hbm [shape: f32[8,8], index: 3, kind: input, shape index: {}]   ;;  %s1925_s4 = inlined_call_operand.hbm [shape: bf16[32,32], index: 4, kind: input, shape index: {}]   ;;  %s1926_s5 = inlined_call_operand.vmem [shape: f32[1,32], index: 5, kind: input, shape index: {}]   ;;  %s1927_s6 = inlined_call_operand.hbm [shape: bf16[32,32], index: 6, kind: input, shape index: {}]   ;;  %s1928_s7 = inlined_call_operand.vmem [shape: f32[1,32], index: 7, kind: input, shape index: {}]   ;;  %s1929_s8 = inlined_call_operand.hbm [shape: bf16[32,32], index: 8, kind: input, shape index: {}]   ;;  %s1930_s9 = inlined_call_operand.vmem [shape: f32[1,32], index: 9, kind: input, shape index: {}]   ;;  %s1931_s10 = inlined_call_operand.hbm [shape: bf16[32,32], index: 10, kind: input, shape index: {}]   ;;  %s1932_s11 = inlined_call_operand.vmem [shape: f32[1,32], index: 11, kind: input, shape index: {}]   ;;  %s1933_s12 = inlined_call_operand.hbm [shape: f32[2,8,32], index: 12, kind: output, shape index: {}]  }
   0x1   :  { %1948 = sst [smem:[#allocation29_spill]] %s1922_s1 }
   0x2   :  { %1949 = sst [smem:[#allocation30_spill]] %s1924_s3 }
   0x3   :  { %1950 = sst [smem:[#allocation31_spill]] %s1925_s4 }
   0x4   :  { %1951 = sst [smem:[#allocation32_spill]] %s1927_s6 }
   0x5   :  { %1952 = sst [smem:[#allocation33_spill]] %s1932_s11 }
   0x6   :  { %1953 = sst [smem:[#allocation34_spill]] %s1933_s12 }
   0x7   :  { %17 = vsyncpa [#allocation3], 0 }
   0x8   :  { %19 = vsyncpa [#allocation3 + $0x1], 0 }
   0x9   :  { %20 = vsyncpa [#allocation6], 0 }
   0xa   :  { %22 = vsyncpa [#allocation6 + $0x1], 0 }
   0xb   :  { %23 = vsyncpa [#allocation9], 0 }
   0xc   :  { %24 = vsyncpa [#allocation12], 0 }
   0xd   :  { %25 = vsyncpa [#allocation15], 0 }
   0xe   :  { %26 = vsyncpa [#allocation4], 0 }
   0xf   :  { %28 = vsyncpa [#allocation4 + $0x1], 0  ;;  %s1643_s21 = smov 0   ;;  %s1645_s22 = smov 0  }
  0x10   :  { %s1647_s23 = smov 0   ;;  %s1649_s24 = smov 0  }
  0x11 LB: > { %1954 = sst [smem:[#allocation23_spill]] %s1555_s21  ;;  %s1667_s28 = sadd.s32 4294967295, %s1567_s24   ;;  %s1567_s24 = sphi %s1649_s24, %s1986_s24   ;;  %s1563_s23 = sphi %s1647_s23, %s1990_s23   ;;  %s1559_s22 = sphi %s1645_s22, %s1989_s22   ;;  %s1555_s21 = sphi %s1643_s21, %s1988_s21  }
  0x12   : > { %1955 = sst [smem:[#allocation24_spill]] %s1567_s24  ;;  %p1047_p0 = scmp.ge.s32.totalorder %s1567_s24, 1 }
  0x13   : > { %s1956_s3 = sld [smem:[#allocation30_spill]]  ;;  %p1944_p1 = scmp.eq.s32.totalorder %s1667_s28, 0 }
  0x14   : > { %p332_p2 = scmp.lt.s32.totalorder %s1567_s24, 3  ;;  %s1569_s30 = smov [#allocation8]  }
  0x15   : > { %s346_s13 = sshll.u32 %s1569_s30, 4  ;;  %s1958_s6 = sld [smem:[#allocation32_spill]]  ;;  %s347_s13 = int_to_ptr.vmem [resolvable:$true] %s346_s13 }
  0x16   : > { %p1672_p3 = pnand %p1047_p0, %p332_p2  ;;  %s1570_s18 = smov [#allocation11]  }
  0x17   : > { %s374_s19 = sshll.u32 %s1570_s18, 4  ;;  %s1934_s20 = smov 64   ;;  %s375_s19 = int_to_ptr.vmem [resolvable:$true] %s374_s19 }
  0x18   : > { %p1150_p5 = pneg %p1672_p3  ;;  %s1936_s25 = smov 4  }
  0x19   : > { %s344_s27 = sshll.u32 %s1956_s3, 4  ;;  %s1046_s26 = sadd.s32 4294967294, %s1567_s24   ;;  %s345_s27 = int_to_ptr.hbm [resolvable:$true] %s344_s27 }
  0x1a   : > { %p1684_p6 = pnand %p1150_p5, %p1944_p1  ;;  %s1697_s30 = sadd.s32 1, %s1567_s24  }
  0x1b   : > { %s372_s16 = sshll.u32 %s1958_s6, 4  ;;  %1960 = sst [smem:[#allocation25_spill]] %s1697_s30  ;;  %s373_s16 = int_to_ptr.hbm [resolvable:$true] %s372_s16 }
  0x1c   : > { %1153 = dma.hbm_to_vmem [thread:$0]  (!%p1684_p6), %s345_s27, 128, %s347_s13, [#allocation9]  }
  0x1d   : > { %1159 = dma.hbm_to_vmem [thread:$0]  (!%p1684_p6), %s373_s16, 256, %s375_s19, [#allocation12], %s1934_s20, %s1934_s20, %s1936_s25  }
  0x1e   : > { %s38_s14 = ssub.s32 %s1567_s24, %s1697_s30  ;;  %s41_s15 = sadd.s32 1, %s1563_s23 }
  0x1f   : > { %p39_p7 = scmp.eq.s32.totalorder %s38_s14, 0  ;;  %p48_p8 = scmp.ne.s32.totalorder %s1563_s23, %s1559_s22 }
  0x20   : > { %p49_p9 = scmp.eq.s32.totalorder %s1567_s24, 0  ;;  %p54_p10 = scmp.ne.s32.totalorder %s1559_s22, %s1555_s21 }
  0x21   : > { %s1708_s27 = scalar_select %p39_p7, %s1563_s23, %s41_s15  }
  0x22   : > { %p50_p11 = por %p49_p9, %p48_p8  ;;  %p1712_p12 = por %p1944_p1, %p54_p10 }
  0x23   : > { %1961 = sst [smem:[#allocation26_spill]] %s1708_s27  ;;  %p319_p13 = scmp.eq.s32.totalorder %s1667_s28, 1 }
  0x24   : > { %p325_p0 = scmp.eq.s32.totalorder %s1046_s26, 1  ;;  %p1185_p2 = scmp.lt.s32.totalorder %s1567_s24, 2 }
  0x25   : > { %s1941_s16 = sand.u32 1, %s1563_s23   ;;  %p1719_p5 = por %p319_p13, %p48_p8 }
  0x26   : > { %p1723_p4 = por %p325_p0, %p54_p10  ;;  %s1729_s14 = sshll.u32 %s1941_s16, 2 }
  0x27   : > { %s1963_s18 = scalar_select %p1719_p5, 1, 0 }
  0x28   : > { %s1965_s19 = scalar_select %p1723_p4, 1, 0 }
  0x29   : > { %1964 = sst [smem:[#allocation27_spill]] %s1963_s18  ;;  %s1732_s15 = sshll.u32 %s1567_s24, 2 }
  0x2a   : > { %1966 = sst [smem:[#allocation28_spill]] %s1965_s19  ;;  %p1734_p7 = pnand %p1185_p2, %p50_p11 }
  0x2b   : > { %s444_s26 = sand.u32 1, %s1567_s24   ;;  %s1968_s1 = sld [smem:[#allocation29_spill]] }
  0x2c   : > { %s448_s30 = scalar_lea.vmem [#allocation5], %s1729_s14  ;;  %s1744_s16 = scalar_lea.sflag [#allocation6], %s444_s26 }
  0x2d   : > { %s456_s19 = sshll.u32 %s448_s30, 4  ;;  %p1309_p9 = pneg %p1734_p7  ;;  %s457_s19 = int_to_ptr.vmem [resolvable:$true] %s456_s19 }
  0x31   : > { %s452_s6 = scalar_lea.hbm %s1968_s1, %s1732_s15 }
  0x32   : > { %s454_s27 = sshll.u32 %s452_s6, 4  ;;  %s1312_s6 = scalar_lea.hbm %s1968_s1, 8  ;;  %s455_s27 = int_to_ptr.hbm [resolvable:$true] %s454_s27 }
  0x33   : > { %s1305_s21 = sshra.s32 %s455_s27, 4  ;;  %s1306_s21 = int_to_ptr.hbm [resolvable:$true] %s1305_s21 }
  0x34   : > { %s1307_s11 = scalar_lea.hbm %s1306_s21, 4  ;;  %p1313_p13 = scmp.lt.s32.totalorder %s1306_s21, %s1968_s1 }
  0x35   : > { %p1308_p8 = scmp.ne.s32.totalorder %s1306_s21, %s1307_s11  ;;  %p1314_p0 = scmp.lt.s32.totalorder %s1312_s6, %s1307_s11 }
  0x37   : > { %p1310_p10 = pnand %p1309_p9, %p1308_p8  ;;  %p1315_p2 = por %p1314_p0, %p1313_p13 }
  0x39   : > { %p1311_p11 = pneg %p1310_p10 }
  0x3b   : > { %p1316_p1 = pnand %p1315_p2, %p1311_p11 }
  0x3d   : > { %1319 = shalt.err (!%p1316_p1)
}
  0x3e   : > { %1172 = dma.hbm_to_vmem [thread:$0]  (!%p1734_p7), %s455_s27, 64, %s457_s19, %s1744_s16  }
  0x3f   : > { %s1969_s4 = sld [smem:[#allocation31_spill]]  ;;  %s1573_s24 = smov [#allocation10]  }
  0x40   : > { %s357_s3 = sshll.u32 %s1573_s24, 4  ;;  %s389_s6 = sshll.u32 %s1929_s8, 4  ;;  %s358_s3 = int_to_ptr.vmem [resolvable:$true] %s357_s3  ;;  %s390_s6 = int_to_ptr.hbm [resolvable:$true] %s389_s6 }
  0x41   : > { %s1970_s25 = smov 4   ;;  %s1971_s30 = smov 64  }
  0x42   : > { %s1574_s27 = smov [#allocation13]   ;;  %s406_s1 = sshll.u32 %s1931_s10, 4  ;;  %s407_s1 = int_to_ptr.hbm [resolvable:$true] %s406_s1 }
  0x43   : > { %s391_s18 = sshll.u32 %s1574_s27, 4  ;;  %s1575_s24 = smov [#allocation14]   ;;  %s392_s18 = int_to_ptr.vmem [resolvable:$true] %s391_s18 }
  0x44   : > { %1162 = dma.hbm_to_vmem [thread:$0]  (!%p1684_p6), %s390_s6, 256, %s392_s18, [#allocation12], %s1971_s30, %s1971_s30, %s1970_s25  }
  0x45   : > { %s355_s12 = sshll.u32 %s1969_s4, 4  ;;  %s408_s11 = sshll.u32 %s1575_s24, 4  ;;  %s356_s12 = int_to_ptr.hbm [resolvable:$true] %s355_s12  ;;  %s409_s11 = int_to_ptr.vmem [resolvable:$true] %s408_s11 }
  0x46   : > { %1156 = dma.hbm_to_vmem [thread:$0]  (!%p1684_p6), %s356_s12, 256, %s358_s3, [#allocation9], %s1971_s30, %s1971_s30, %s1970_s25  }
  0x47   : > { %s433_s21 = scalar_lea.hbm %s1921_s0, %s1732_s15  ;;  %s429_s19 = scalar_lea.vmem [#allocation2], %s1729_s14 }
  0x48   : > { %1165 = dma.hbm_to_vmem [thread:$0]  (!%p1684_p6), %s407_s1, 256, %s409_s11, [#allocation15], %s1971_s30, %s1971_s30, %s1970_s25  }
  0x49   : > { %s435_s27 = sshll.u32 %s433_s21, 4  ;;  %s437_s26 = sshll.u32 %s429_s19, 4  ;;  %s436_s27 = int_to_ptr.hbm [resolvable:$true] %s435_s27  ;;  %s438_s26 = int_to_ptr.vmem [resolvable:$true] %s437_s26 }
  0x4a   : > { %s1972_s4 = sand.u32 1, %s1563_s23   ;;  %s1425_s18 = sshra.s32 %s436_s27, 4  ;;  %s1426_s18 = int_to_ptr.hbm [resolvable:$true] %s1425_s18 }
  0x4b   : > { %s426_s6 = scalar_lea.sflag [#allocation3], %s1972_s4  ;;  %s1427_s24 = scalar_lea.hbm %s1426_s18, 4 }
  0x4c   : > { %p1428_p1 = scmp.ne.s32.totalorder %s1426_s18, %s1427_s24  ;;  %s1432_s3 = scalar_lea.hbm %s1921_s0, 8 }
  0x4d   : > { %p1433_p6 = scmp.lt.s32.totalorder %s1426_s18, %s1921_s0  ;;  %p1434_p11 = scmp.lt.s32.totalorder %s1432_s3, %s1427_s24 }
  0x4e   : > { %p1430_p8 = pnand %p1428_p1, %p1309_p9 }
  0x4f   : > { %p1435_p13 = por %p1434_p11, %p1433_p6 }
  0x50   : > { %p1431_p10 = pneg %p1430_p8 }
  0x52   : > { %p1436_p0 = pnand %p1435_p13, %p1431_p10 }
  0x54   : > { %1439 = shalt.err (!%p1436_p0)
}
  0x55   : > { %1169 = dma.hbm_to_vmem [thread:$0]  (!%p1734_p7), %s436_s27, 64, %s438_s26, %s426_s6  }
  0x56   : > { %s471_s11 = scalar_lea.hbm %s1923_s2, %s1732_s15  ;;  %s467_s19 = scalar_lea.vmem [#allocation7], %s1729_s14 }
  0x57   : > { %s473_s21 = sshll.u32 %s471_s11, 4  ;;  %s475_s17 = sshll.u32 %s467_s19, 4  ;;  %s474_s21 = int_to_ptr.hbm [resolvable:$true] %s473_s21  ;;  %s476_s17 = int_to_ptr.vmem [resolvable:$true] %s475_s17 }
  0x58   : > { %s1455_s18 = sshra.s32 %s474_s21, 4  ;;  %s1462_s27 = scalar_lea.hbm %s1923_s2, 8  ;;  %s1456_s18 = int_to_ptr.hbm [resolvable:$true] %s1455_s18 }
  0x59   : > { %s1457_s24 = scalar_lea.hbm %s1456_s18, 4  ;;  %p1463_p10 = scmp.lt.s32.totalorder %s1456_s18, %s1923_s2 }
  0x5a   : > { %p1458_p2 = scmp.ne.s32.totalorder %s1456_s18, %s1457_s24  ;;  %p1464_p6 = scmp.lt.s32.totalorder %s1462_s27, %s1457_s24 }
  0x5c   : > { %p1460_p1 = pnand %p1458_p2, %p1309_p9  ;;  %p1465_p11 = por %p1464_p6, %p1463_p10 }
  0x5e   : > { %p1461_p8 = pneg %p1460_p1 }
  0x60   : > { %p1466_p13 = pnand %p1465_p11, %p1461_p8 }
  0x62   : > { %1469 = shalt.err (!%p1466_p13)
}
  0x63   : > { %1175 = dma.hbm_to_vmem [thread:$0]  (!%p1734_p7), %s474_s21, 64, %s476_s17, %s1744_s16  }
  0x64   : > { %484 = sbr.rel (%p1672_p3) target bundleno = 1163 (0x48b), region = 68  ;;  %s1822_s14 = sand.u32 (!%p1672_p3), 1, %s1559_s22  }
  0x65   : > { %s1825_s15 = sshll.u32 (!%p1672_p3), %s1822_s14, 2  ;;  %s487_s1 = scalar_lea.sflag (!%p1672_p3), [#allocation3], %s1822_s14 }
  0x66   : > { %s490_s25 = scalar_lea.vmem (!%p1672_p3), [#allocation2], %s1825_s15 }
  0x69   : > { %1530 = dma.done.wait (%p1712_p12), %s487_s1, 64  }
  0x6a   : > { %1532 = vsyncadd (%p1712_p12), %s487_s1, 4294967232  ;;  %s496_s29 = sand.u32 1, %s1667_s28   ;;  %s500_s16 = scalar_lea.vmem [#allocation5], %s1825_s15 }
  0x6b   : > { %s497_s20 = scalar_lea.sflag [#allocation6], %s496_s29 }
  0x6c   : > { %1534 = dma.done.wait (%p1712_p12), %s497_s20, 128  }
  0x6d   : > { %1536 = vsyncadd (%p1712_p12), %s497_s20, 4294967168  ;;  %s510_s4 = scalar_lea.vmem [#allocation7], %s1825_s15  ;;  %p1973_p3 = scmp.eq.s32.totalorder %s1667_s28, 0 }
  0x6f   : > { %1538 = dma.done.wait (%p1973_p3), [#allocation9], 384   ;;  %p1974_p7 = pmov %p1973_p3 }
  0x70   : > { %p1975_p9 = pmov %p1973_p3 }
  0x71   : > { %1540 = vsyncadd (%p1974_p7), [#allocation9], 4294966912 }
  0x72   : > { %1542 = dma.done.wait (%p1975_p9), [#allocation12], 512   ;;  %p1976_p0 = pmov %p1973_p3 }
  0x74   : > { %1544 = vsyncadd (%p1976_p0), [#allocation12], 4294966784  ;;  %p1977_p2 = pmov %p1976_p0 }
  0x75   : > { %p1978_p1 = pmov %p1976_p0 }
  0x76   : > { %1546 = dma.done.wait (%p1977_p2), [#allocation15], 256  }
  0x77   : > { %1548 = vsyncadd (%p1978_p1), [#allocation15], 4294967040  ;;  %v1115_v0 = vld [vmem:[#allocation10 + $0x8] sm:$0xff]  ;;  %v1117_v1 = vld [vmem:[#allocation11 + $0x8] sm:$0xff]  ;;  %vm609_vm0 = vcmask 261120   ;;  %vm705_vm1 = vcmask 130048  }
  0x78   : > { %v1114_v2 = vld [vmem:[#allocation10] sm:$0xff]  ;;  %619 = vmatpush.bf16.msra.mxu0 %v1115_v0  ;;  %658 = vmatpush.bf16.msra.mxu1 %v1117_v1  ;;  %v1116_v3 = vld [vmem:[#allocation11] sm:$0xff]  ;;  %v628_v5 = vld [vmem:[%s500_s16] sm:$0xf]  ;;  %s1576_s19 = smov 112   ;;  %vm725_vm2 = vcmask 64512  }
  0x79   : > { %v588_v4 = vld [vmem:[%s490_s25] sm:$0xf]  ;;  %v1119_v27 = vld [vmem:[#allocation13 + $0x8] sm:$0xff]  ;;  %v666_v29 = vld [vmem:[%s510_s4] sm:$0xf]  ;;  %vm741_vm3 = vcmask 1043456  }
  0x7a   : > { %v1233_v6 = vld [vmem:[%s1926_s5] ss:$0 sm:$0xff]  ;;  %696 = vmatpush.bf16.msra.mxu2 %v1119_v27  ;;  %v704_v30 = vld [vmem:[#allocation8] sm:$0xff]  ;;  %s1577_s24 = smov 16   ;;  %s1111_s12 = sshll.u32 %s1667_s28, 3 }
  0x7b   : > { %v1234_v7 = vld [vmem:[%s1928_s7] ss:$0 sm:$0xff]  ;;  %v1121_v1 = vld [vmem:[#allocation14 + $0x8] sm:$0xff]  ;;  %s1069_s3 = sshll.u32 %s1822_s14, 3  ;;  %s1979_s6 = sld [smem:[#allocation34_spill]] }
  0x7c   : > { %620 = vmatpush.bf16.msra.mxu0 %v1114_v2  ;;  %659 = vmatpush.bf16.msra.mxu1 %v1116_v3  ;;  %v1118_v28 = vld [vmem:[#allocation13] sm:$0xff]  ;;  %v1120_v2 = vld [vmem:[#allocation14] sm:$0xff]  ;;  %s1981_s20 = sld [smem:[#allocation33_spill]]  ;;  %s586_s16 = scalar_lea.vmem [#allocation16], %s1069_s3 }
  0x7d   : > { %v1235_v37 = vld [vmem:[%s1930_s9] ss:$0 sm:$0xff]  ;;  %s882_s4 = sshll.u32 %s586_s16, 4  ;;  %s870_s28 = scalar_lea.sflag [#allocation4], %s1822_s14  ;;  %s883_s4 = int_to_ptr.vmem [resolvable:$true] %s882_s4 }
  0x7e   : > { %697 = vmatpush.bf16.msra.mxu2 %v1118_v28 }
  0x7f   : > { %1078 = vmatmul.msk.bf16.vlgmr.msra.gmra.mxu0 %vm609_vm0, %v588_v4  ;;  %1087 = vmatmul.msk.bf16.vlgmr.msra.gmra.mxu1 %vm609_vm0, %v628_v5 }
  0x81   : > { %1096 = vmatmul.msk.bf16.vlgmr.msra.gmra.mxu2 %vm609_vm0, %v666_v29  ;;  %s880_s1 = scalar_lea.hbm %s1979_s6, %s1111_s12  ;;  %s1505_s17 = scalar_lea.hbm %s1979_s6, 16 }
  0x82   : > { %s884_s13 = sshll.u32 %s880_s1, 4  ;;  %s885_s13 = int_to_ptr.hbm [resolvable:$true] %s884_s13 }
  0x83   : > { %s1499_s30 = sshra.s32 %s885_s13, 4  ;;  %s1500_s30 = int_to_ptr.hbm [resolvable:$true] %s1499_s30 }
  0x84   : > { %s1501_s11 = scalar_lea.hbm %s1500_s30, 8  ;;  %p1506_p6 = scmp.lt.s32.totalorder %s1500_s30, %s1979_s6 }
  0x85   : > { %p1502_p12 = scmp.ne.s32.totalorder %s1500_s30, %s1501_s11  ;;  %p1507_p11 = scmp.lt.s32.totalorder %s1505_s17, %s1501_s11 }
  0x87   : > { %p1503_p8 = pnand %p1502_p12, %p1719_p5  ;;  %p1508_p13 = por %p1507_p11, %p1506_p6 }
  0x89   : > { %p1504_p10 = pneg %p1503_p8 }
  0x8b   : > { %p1509_p3 = pnand %p1508_p13, %p1504_p10 }
  0xfc   : > { %v622_v8 = vpop.f32.mrf.mxu0  ;;  %v661_v9 = vpop.f32.mrf.mxu1 }
  0xfd   : > { %v623_v10 = vadd.f32 %v1233_v6, %v622_v8  ;;  %v662_v11 = vadd.f32 %v1234_v7, %v661_v9 }
  0xff   : > { %v626_v12 = vmul.f32 0.25, %v623_v10  ;;  %v665_v13 = vpack.c.bf16 %v662_v11, %v662_v11 }
 0x101   : > { %v627_v14 = vpack.c.bf16 %v626_v12, %v626_v12  ;;  %v710_v15 = vsel %vm705_vm1, %v665_v13, 0  ;;  %v765_v16 = vunpack.c.l.b16 %v665_v13  ;;  %v1236_v13 = vld [vmem:[%s1981_s20] ss:$0 sm:$0xff] }
 0x102   : > { %719 = vmatpush.bf16.xpose.msra.mxu3 %v710_v15 }
 0x103   : > { %v766_v17 = vpack.c.b16 %v765_v16, %v765_v16  ;;  %v760_v20 = vunpack.c.l.b16 %v627_v14 }
 0x104   : > { %v624_v18 = vpop.f32.mrf.mxu0  ;;  %v663_v19 = vpop.f32.mrf.mxu1 }
 0x105   : > { %767 = vrot.lane.b32.xlu0 %v766_v17, %s1576_s19  ;;  %v761_v21 = vpack.c.b16 %v760_v20, %v760_v20  ;;  %v699_v38 = vpop.f32.mrf.mxu2 }
 0x106   : > { %v700_v39 = vadd.f32 %v1235_v37, %v699_v38 }
 0x108   : > { %v703_v41 = vpack.c.bf16 %v700_v39, %v700_v39 }
 0x109   : > { %1097 = vmatmul.msk.bf16.vlgmr.msra.gmra.mxu3 %vm705_vm1, %v627_v14 }
 0x10a   : > { %v743_v43 = vsel %vm741_vm3, %v703_v41, 0  ;;  %v801_v53 = vunpack.c.l.b16 %v703_v41  ;;  %861 = vmatpush.bf16.msrb.mxu3 %v1121_v1 }
 0x10b   : > { %752 = vmatpush.bf16.msrb.mxu0 %v743_v43 }
 0x10c   : > { %v802_v54 = vpack.c.b16 %v801_v53, %v801_v53 }
 0x10d   : > { %762 = vrot.lane.b32.xlu0 %v761_v21, %s1576_s19  ;;  %v701_v45 = vpop.f32.mrf.mxu2 }
 0x10e   : > { %862 = vmatpush.bf16.msrb.mxu3 %v1120_v2 }
 0x177   : > { %v768_v22 = vpop.permute.xlu0 %767 }
 0x178   : > { %v773_v23 = vsel %vm705_vm1, %v768_v22, 0 }
 0x179   : > { %782 = vmatpush.bf16.xpose.msrb.mxu1 %v773_v23 }
 0x17f   : > { %v763_v24 = vpop.permute.xlu0 %762 }
 0x180   : > { %1099 = vmatmul.msk.bf16.vlgmr.msrb.gmra.mxu1 %vm705_vm1, %v763_v24 }
 0x18c   : > { %v721_v25 = vpop.f32.mrf.mxu3 }
 0x18d   : > { %v722_v34 = vadd.f32 %v721_v25, %v704_v30 }
 0x18f   : > { %v726_v36 = vsel %vm725_vm2, %v722_v34, -inf }
 0x194   : > { %v723_v26 = vpop.f32.mrf.mxu3 }
 0x1fd   : > { %v784_v31 = vpop.f32.mrf.mxu1 }
 0x1fe   : > { %v785_v32 = vadd.f32 %v784_v31, %v704_v30 }
 0x200   : > { %v788_v33 = vsel %vm725_vm2, %v785_v32, -inf }
 0x201   : > { %789 = vmax.xlane.f32.xlu1 %v788_v33 }
 0x205   : > { %v786_v35 = vpop.f32.mrf.mxu1 }
 0x209   : > { %727 = vmax.xlane.f32.xlu1 %v726_v36 }
 0x274   : > { %v790_v40 = vpop.xlane.xlu1 %789 }
 0x275   : > { %v791_v42 = vsub.f32 %v785_v32, %v790_v40 }
 0x277   : > { %v792_v44 = vmul.f32 1.442695, %v791_v42 }
 0x279   : > { %1237 = vpow2.f32 %v792_v44 }
 0x27c   : > { %v728_v46 = vpop.xlane.xlu1 %727 }
 0x27d   : > { %v729_v47 = vsub.f32 %v722_v34, %v728_v46 }
 0x27f   : > { %v1238_v48 = vpop.eup %1237  ;;  %v730_v49 = vmul.f32 1.442695, %v729_v47 }
 0x280   : > { %v794_v50 = vsel %vm725_vm2, %v1238_v48, 0.0 }
 0x281   : > { %1239 = vpow2.f32 %v730_v49  ;;  %795 = vadd.xlane.f32.xlu2 %v794_v50 }
 0x287   : > { %v1240_v51 = vpop.eup %1239 }
 0x288   : > { %v732_v52 = vsel %vm725_vm2, %v1240_v51, 0.0 }
 0x289   : > { %733 = vadd.xlane.f32.xlu0 %v732_v52 }
 0x299   : > { %803 = vrot.lane.b32.xlu2 %v802_v54, %s1576_s19 }
 0x2f4   : > { %v796_v55 = vpop.xlane.xlu2 %795 }
 0x2f5   : > { %1241 = vrcp.f32 %v796_v55 }
 0x2fb   : > { %v1242_v56 = vpop.eup %1241 }
 0x2fc   : > { %v798_v57 = vmul.f32 %v1242_v56, %v1238_v48  ;;  %v804_v58 = vpop.permute.xlu2 %803  ;;  %v734_v59 = vpop.xlane.xlu0 %733 }
 0x2fd   : > { %1243 = vrcp.f32 %v734_v59  ;;  %v809_v60 = vsel %vm741_vm3, %v804_v58, 0 }
 0x2fe   : > { %818 = vmatpush.bf16.msrb.mxu2 %v809_v60  ;;  %v799_v61 = vpack.c.bf16 %v798_v57, %v798_v57 }
 0x301   : > { %1100 = vmatmul.msk.bf16.vlgmr.msrb.gmra.mxu2 %vm725_vm2, %v799_v61 }
 0x303   : > { %v1244_v62 = vpop.eup %1243 }
 0x304   : > { %v736_v63 = vmul.f32 %v1244_v62, %v1240_v51 }
 0x306   : > { %v737_v0 = vpack.c.bf16 %v736_v63, %v736_v63 }
 0x308   : > { %1098 = vmatmul.msk.bf16.vlgmr.msrb.gmra.mxu0 %vm725_vm2, %v737_v0 }
 0x384   : > { %v820_v3 = vpop.f32.mrf.mxu2 }
 0x385   : > { %v824_v4 = vpack.c.bf16 %v820_v3, %v820_v3  ;;  %v754_v5 = vpop.f32.mrf.mxu0 }
 0x386   : > { %v758_v10 = vpack.c.bf16 %v754_v5, %v754_v5 }
 0x387   : > { %v826_v6 = vunpack.c.l.b16 %v824_v4 }
 0x389   : > { %v827_v7 = vpack.c.b16 %v826_v6, %v826_v6 }
 0x38b   : > { %828 = vrot.lane.b32.xlu1 %v827_v7, %s1577_s24 }
 0x38c   : > { %v822_v8 = vpop.f32.mrf.mxu2 }
 0x38d   : > { %v756_v9 = vpop.f32.mrf.mxu0 }
 0x3fd   : > { %v829_v11 = vpop.permute.xlu1 %828 }
 0x3fe   : > { %v832_v12 = vsel %vm705_vm1, %v758_v10, %v829_v11 }
 0x3ff   : > { %1109 = vmatmul.msk.bf16.vlgmr.msrb.gmra.mxu3 %vm609_vm0, %v832_v12 }
 0x482   : > { %v864_v14 = vpop.f32.mrf.mxu3 }
 0x483   : > { %v865_v15 = vadd.f32 %v1236_v13, %v864_v14 }
 0x485   : > { %868 = vst.msk [vmem:[%s586_s16] sm:$0xff] %vm609_vm0, %v865_v15 }
 0x486   : > { %1512 = shalt.err (!%p1509_p3)
}
 0x487   : > { %1148 = dma.vmem_to_hbm [thread:$0]  (%p1719_p5), %s883_s4, 128, %s885_s13, %s870_s28  }
 0x48a   : > { %v866_v16 = vpop.f32.mrf.mxu3 }
 0x48b PF: > { %s1982_s14 = sld [smem:[#allocation23_spill]] }
 0x48c   : > { %s1984_s3 = sld [smem:[#allocation24_spill]] }
 0x491   : > { %s896_s27 = sand.u32 1, %s1982_s14  }
 0x492   : > { %p1985_p7 = scmp.ge.s32.totalorder %s1984_s3, 2  ;;  %s897_s26 = scalar_lea.sflag [#allocation4], %s896_s27 }
 0x494   : > { %p1177_p9 = pnand %p1985_p7, %p1723_p4 }
 0x496   : > { %p1178_p0 = pneg %p1177_p9 }
 0x498   : > { %1550 = dma.done.wait (%p1178_p0), %s897_s26, 128  }
 0x499   : > { %1552 = vsyncadd (%p1178_p0), %s897_s26, 4294967168  ;;  %s1986_s24 = sld [smem:[#allocation25_spill]]  ;;  %s1988_s21 = smov %s1559_s22 }
 0x49a   : > { %s1987_s1 = sld [smem:[#allocation26_spill]]  ;;  %s1989_s22 = smov %s1563_s23 }
 0x49f   : > { %p31_p2 = scmp.ge.s32.totalorder %s1986_s24, 4  }
 0x4a0   : > { %s1990_s23 = smov %s1987_s1 }
 0x4a1   :  { %33 = sbr.rel (!%p31_p2) target bundleno = 17 (0x11), region = 157 }
 0x4a6   :  { %903 = vsyncpa [#allocation3], 1 }
 0x4a7   :  { %905 = vsyncpa [#allocation3 + $0x1], 1 }
 0x4a8   :  { %906 = vsyncpa [#allocation6], 1 }
 0x4a9   :  { %908 = vsyncpa [#allocation6 + $0x1], 1 }
 0x4aa   :  { %909 = vsyncpa [#allocation9], 1 }
 0x4ab   :  { %910 = vsyncpa [#allocation12], 1 }
 0x4ac   :  { %911 = vsyncpa [#allocation15], 1 }
 0x4ad   :  { %912 = vsyncpa [#allocation4], 1 }
 0x4ae   :  { %914 = vsyncpa [#allocation4 + $0x1], 1 }

</bundles_post_ra>
